<compile_context>
chip_gen: v6e
topology: v6e:2x2x1
jax: 0.10.0
libtpu: 0.0.40
codegen_flags: <defaults>
</compile_context>

<pallas_src>
import functools

import jax
import jax.numpy as jnp
from jax.experimental import pallas as pl
from jax.experimental.pallas import tpu as pltpu


def _round_up(x, m):
    return ((x + m - 1) // m) * m


def _pick_tile(n, cap=512, step=128):
    """Largest multiple of `step` <= cap that divides n (n is a multiple of step)."""
    t = min(cap, n)
    while n % t:
        t -= step
    return t


# ----------------------------------------------------------------------------
# Kernel 1: per-node-type linear projection + ReLU   y = relu(x @ W + b)
# Tiled over row blocks ("parallel"), bf16 inputs, f32 accumulate/output.
# ----------------------------------------------------------------------------
def _linear_relu_kernel(x_ref, w_ref, b_ref, o_ref):
    y = jnp.dot(x_ref[...], w_ref[...], preferred_element_type=jnp.float32)
    o_ref[...] = jnp.maximum(y + b_ref[...], 0.0)


def linear_relu(x, w, b, row_tile=256):
    n, din = x.shape
    dout = w.shape[1]
    din_p, dout_p = _round_up(din, 128), _round_up(dout, 128)
    if n >= row_tile:
        n_p, tm = _round_up(n, row_tile), row_tile
    else:
        n_p = _round_up(n, 8)
        tm = n_p
    x_p = jnp.zeros((n_p, din_p), jnp.bfloat16).at[:n, :din].set(x.astype(jnp.bfloat16))
    w_p = jnp.zeros((din_p, dout_p), jnp.bfloat16).at[:din, :dout].set(w.astype(jnp.bfloat16))
    b_p = jnp.zeros((1, dout_p), jnp.float32).at[0, :dout].set(b.astype(jnp.float32))
    out = pl.pallas_call(
        _linear_relu_kernel,
        out_shape=jax.ShapeDtypeStruct((n_p, dout_p), jnp.float32),
        grid=(n_p // tm,),
        in_specs=[
            pl.BlockSpec((tm, din_p), lambda i: (i, 0)),
            pl.BlockSpec((din_p, dout_p), lambda i: (0, 0)),
            pl.BlockSpec((1, dout_p), lambda i: (0, 0)),
        ],
        out_specs=pl.BlockSpec((tm, dout_p), lambda i: (i, 0)),
        compiler_params=pltpu.CompilerParams(dimension_semantics=("parallel",)),
    )(x_p, w_p, b_p)
    # drop padded rows; keep the lane-padded (zero) feature columns for the conv stack
    return out[:n]


# ----------------------------------------------------------------------------
# Kernel 2a: fused root + basis feature projection for one RGCNConv layer.
#   xr = x @ root                       (f32, accumulator seed)
#   H  = x @ [basis_0 | ... | basis_B]  (bf16, lane-padded, packed along lanes)
# Single MXU matmul per row tile; grid over node-row tiles ("parallel").
# ----------------------------------------------------------------------------
def _rgcn_proj_kernel(x_ref, w_ref, xr_ref, h_ref, *, d_pad):
    y = jnp.dot(x_ref[...].astype(jnp.bfloat16), w_ref[...],
                preferred_element_type=jnp.float32)
    xr_ref[...] = y[:, :d_pad]
    h_ref[...] = y[:, d_pad:].astype(h_ref.dtype)


# ----------------------------------------------------------------------------
# Kernel 2b: message passing + mean aggregation for one RGCNConv layer.
#   out[i] = xr[i] + sum_{k,r} A_r[i,k] @ (sum_b comp[r,b] * H_b[k])
# Grid = (row tiles "parallel", contraction tiles, relations); the basis
# combine is VPU work hidden under the A_r @ M matmul; the f32 output block
# stays resident in VMEM across both reduction axes (no scratch accumulator).
# ----------------------------------------------------------------------------
def _rgcn_conv_kernel(cvec_ref, adj_ref, h_ref, xr_ref, o_ref, *,
                      num_bases, d_pad, apply_relu):
    k = pl.program_id(1)
    r = pl.program_id(2)

    @pl.when((k == 0) & (r == 0))
    def _():
        o_ref[...] = xr_ref[...]          # root / self-loop term

    h = h_ref[...]                        # (tk, B*d_pad)  bf16
    c = cvec_ref[...]                     # (1,  B*d_pad)  f32, comp[r,b] lane-broadcast
    m = h[:, :d_pad].astype(jnp.float32) * c[:, :d_pad]
    for b in range(1, num_bases):
        sl = slice(b * d_pad, (b + 1) * d_pad)
        m = m + h[:, sl].astype(jnp.float32) * c[:, sl]

    o_ref[...] += jnp.dot(adj_ref[...], m.astype(jnp.bfloat16),
                          preferred_element_type=jnp.float32)

    if apply_relu:
        @pl.when((k == pl.num_programs(1) - 1) & (r == pl.num_programs(2) - 1))
        def _():
            o_ref[...] = jnp.maximum(o_ref[...], 0.0)


def rgcn_conv(x_pad, adj_pad, basis, comp, root, apply_relu, tile_cap=512):
    """One RGCNConv layer (basis decomposition, mean aggregation, root weight,
    no bias).  x_pad: (Np, din_p) f32;  adj_pad: (R, Np, Np) bf16 row-normalized."""
    n_pad, din_p = x_pad.shape
    num_rel, num_bases = comp.shape
    din, dout = root.shape
    d_pad = _round_up(dout, 128)

    # parameter-side glue (tiny): zero-pad to 128 lanes, pack [root | basis_0 ...]
    root_p = jnp.zeros((din_p, d_pad), jnp.bfloat16).at[:din, :dout].set(
        root.astype(jnp.bfloat16))
    basis_p = jnp.zeros((num_bases, din_p, d_pad), jnp.bfloat16).at[
        :, :din, :dout].set(basis.astype(jnp.bfloat16))
    w_cat = jnp.concatenate([root_p[None], basis_p], axis=0)       # (1+B, din_p, d_pad)
    w_cat = jnp.transpose(w_cat, (1, 0, 2)).reshape(din_p, (1 + num_bases) * d_pad)

    tm = _pick_tile(n_pad, tile_cap)
    xr, h = pl.pallas_call(
        functools.partial(_rgcn_proj_kernel, d_pad=d_pad),
        out_shape=(jax.ShapeDtypeStruct((n_pad, d_pad), jnp.float32),
                   jax.ShapeDtypeStruct((n_pad, num_bases * d_pad), jnp.bfloat16)),
        grid=(n_pad // tm,),
        in_specs=[
            pl.BlockSpec((tm, din_p), lambda i: (i, 0)),
            pl.BlockSpec((din_p, (1 + num_bases) * d_pad), lambda i: (0, 0)),
        ],
        out_specs=(pl.BlockSpec((tm, d_pad), lambda i: (i, 0)),
                   pl.BlockSpec((tm, num_bases * d_pad), lambda i: (i, 0))),
        compiler_params=pltpu.CompilerParams(dimension_semantics=("parallel",)),
    )(x_pad, w_cat)

    if num_rel == 0:           # no relations -> output is just the root term
        return jnp.maximum(xr, 0.0) if apply_relu else xr

    # comp[r, b] broadcast across the d_pad lanes of basis b (avoids in-kernel
    # dynamic scalar extraction; tiny array, pure VPU multiply in the kernel).
    c_bcast = jnp.repeat(comp.astype(jnp.float32), d_pad, axis=1)
    c_bcast = c_bcast.reshape(num_rel, 1, num_bases * d_pad)

    tk = _pick_tile(n_pad, tile_cap)
    kern = functools.partial(_rgcn_conv_kernel, num_bases=num_bases,
                             d_pad=d_pad, apply_relu=apply_relu)
    out = pl.pallas_call(
        kern,
        out_shape=jax.ShapeDtypeStruct((n_pad, d_pad), jnp.float32),
        grid=(n_pad // tm, n_pad // tk, num_rel),
        in_specs=[
            pl.BlockSpec((None, 1, num_bases * d_pad), lambda i, k, r: (r, 0, 0)),
            pl.BlockSpec((None, tm, tk), lambda i, k, r: (r, i, k)),       # A_r tile
            pl.BlockSpec((tk, num_bases * d_pad), lambda i, k, r: (k, 0)),  # H tile
            pl.BlockSpec((tm, d_pad), lambda i, k, r: (i, 0)),              # xr tile
        ],
        out_specs=pl.BlockSpec((tm, d_pad), lambda i, k, r: (i, 0)),
        compiler_params=pltpu.CompilerParams(
            dimension_semantics=("parallel", "arbitrary", "arbitrary"),
            vmem_limit_bytes=48 * 1024 * 1024,
        ),
    )(c_bcast, adj_pad, h, xr)
    return out


# ----------------------------------------------------------------------------
# Glue: per-relation row-normalized dense adjacency (mean aggregation), bf16,
# zero-padded to the padded node count.
# ----------------------------------------------------------------------------
def build_rel_adj(edge_index, edge_type, num_nodes, num_relations, n_pad):
    src, dst = edge_index[0], edge_index[1]
    adj = jnp.zeros((num_relations, num_nodes, num_nodes), jnp.float32)
    adj = adj.at[edge_type, dst, src].add(1.0)
    deg = adj.sum(axis=-1, keepdims=True)
    adj = adj / jnp.maximum(deg, 1.0)
    adj = jnp.pad(adj, ((0, 0), (0, n_pad - num_nodes), (0, n_pad - num_nodes)))
    # TODO(synk): for realistically sparse graphs replace this dense O(R*N^2)
    # adjacency with per-relation CSR + scalar-prefetched gather / segment-mean.
    return adj.astype(jnp.bfloat16)


# ----------------------------------------------------------------------------
# Full RGCN forward (mirrors the PyTorch module's forward)
# ----------------------------------------------------------------------------
def rgcn_forward(x_dict, node_types, edge_index, edge_type, num_relations, params,
                 hidden_dim, out_dim):
    # per-node-type projection + ReLU, concat in node_types order
    xs = [linear_relu(x_dict[nt], params["proj"][nt][0], params["proj"][nt][1])
          for nt in node_types]
    x = jnp.concatenate(xs, axis=0)                 # (N, hidden_p) f32, padded cols = 0
    num_nodes = x.shape[0]
    n_pad = _round_up(num_nodes, 128)
    x = jnp.pad(x, ((0, n_pad - num_nodes), (0, 0)))

    adj = build_rel_adj(edge_index, edge_type, num_nodes, num_relations, n_pad)

    x_latents = [x[:num_nodes, :hidden_dim]]
    convs = params["convs"]
    for basis, comp, root in convs[:-1]:
        x = rgcn_conv(x, adj, basis, comp, root, apply_relu=True)
        x_latents.append(x[:num_nodes, :hidden_dim])   # .detach() is a no-op here
    basis, comp, root = convs[-1]
    x = rgcn_conv(x, adj, basis, comp, root, apply_relu=False)
    return x[:num_nodes, :out_dim], x_latents


# ----------------------------------------------------------------------------
# Deterministic parameter / input construction and a single run
# ----------------------------------------------------------------------------
if __name__ == "__main__":
    key = jax.random.PRNGKey(0)

    # metadata: 2 node types, 2 edge types (relations)
    node_types = ["paper", "author"]
    edge_types = [("author", "writes", "paper"), ("paper", "cites", "paper")]
    num_relations = len(edge_types)

    hidden_dim, out_dim, num_bases, num_layers = 32, 16, 2, 2
    n_paper, n_author = 10, 14
    d_paper, d_author = 12, 20
    num_nodes = n_paper + n_author  # paper: 0..9, author: 10..23 (concat order)

    keys = jax.random.split(key, 16)

    # node features
    x_dict = {
        "paper": jax.random.normal(keys[0], (n_paper, d_paper), jnp.float32),
        "author": jax.random.normal(keys[1], (n_author, d_author), jnp.float32),
    }

    # homogeneous edge_index / edge_type (as data.to_homogeneous() would give)
    e_per_rel = 20
    src0 = jax.random.randint(keys[2], (e_per_rel,), n_paper, num_nodes)  # author
    dst0 = jax.random.randint(keys[3], (e_per_rel,), 0, n_paper)          # paper
    src1 = jax.random.randint(keys[4], (e_per_rel,), 0, n_paper)          # paper
    dst1 = jax.random.randint(keys[5], (e_per_rel,), 0, n_paper)          # paper
    edge_index = jnp.stack(
        [jnp.concatenate([src0, src1]), jnp.concatenate([dst0, dst1])], axis=0
    ).astype(jnp.int32)
    edge_type = jnp.concatenate(
        [jnp.zeros((e_per_rel,), jnp.int32), jnp.ones((e_per_rel,), jnp.int32)]
    )

    # parameters (deterministic synthetic init)
    def init(k, shape, scale=0.1):
        return scale * jax.random.normal(k, shape, jnp.float32)

    params = {
        "proj": {
            "paper": (init(keys[6], (d_paper, hidden_dim)),
                      init(keys[7], (hidden_dim,))),
            "author": (init(keys[8], (d_author, hidden_dim)),
                       init(keys[9], (hidden_dim,))),
        },
        "convs": [],
    }
    # num_layers=2 -> convs: [hidden->hidden, hidden->hidden, hidden->out]
    conv_dims = [(hidden_dim, hidden_dim)] * num_layers + [(hidden_dim, out_dim)]
    ck = jax.random.split(keys[10], 3 * len(conv_dims))
    for li, (din, dout) in enumerate(conv_dims):
        basis = init(ck[3 * li + 0], (num_bases, din, dout))
        comp = init(ck[3 * li + 1], (num_relations, num_bases), scale=1.0)
        root = init(ck[3 * li + 2], (din, dout))
        params["convs"].append((basis, comp, root))

    out, latents = rgcn_forward(
        x_dict, node_types, edge_index, edge_type, num_relations, params,
        hidden_dim, out_dim,
    )
    jax.block_until_ready(out)
    for lat in latents:
        jax.block_until_ready(lat)

    assert out.shape == (num_nodes, out_dim)
    assert len(latents) == num_layers + 1
    assert all(lat.shape == (num_nodes, hidden_dim) for lat in latents)
    print("KERNEL_OK")
</pallas_src>

<mosaic_0001>
module attributes {stable_mosaic.version = 11 : i64} {
  func.func @_linear_relu_kernel(%arg0: i32, %arg1: memref<16x128xbf16, #tpu.memory_space<vmem>>, %arg2: memref<128x128xbf16, #tpu.memory_space<vmem>>, %arg3: memref<1x128xf32, #tpu.memory_space<vmem>>, %arg4: memref<16x128xf32, #tpu.memory_space<vmem>>) attributes {dimension_semantics = [#tpu.dimension_semantics<parallel>], iteration_bounds = array<i64: 1>, scalar_prefetch = 0 : i64, scratch_operands = 0 : i64, tpu.core_type = #tpu.core_type<tc>, window_params = [{transform_indices = @transform_0, window_bounds = array<i64: 16, 128>}, {pipeline_mode = #tpu.pipeline_mode<synchronous>, transform_indices = @transform_1, window_bounds = array<i64: 128, 128>}, {pipeline_mode = #tpu.pipeline_mode<synchronous>, transform_indices = @transform_2, window_bounds = array<i64: 1, 128>}, {transform_indices = @transform_3, window_bounds = array<i64: 16, 128>}]} {
    %c0 = arith.constant 0 : index
    %c0_0 = arith.constant 0 : index
    %0 = vector.load %arg1[%c0, %c0_0] : memref<16x128xbf16, #tpu.memory_space<vmem>>, vector<16x128xbf16>
    %c0_1 = arith.constant 0 : index
    %c0_2 = arith.constant 0 : index
    %1 = vector.load %arg2[%c0_1, %c0_2] : memref<128x128xbf16, #tpu.memory_space<vmem>>, vector<128x128xbf16>
    %cst = arith.constant dense<0.000000e+00> : vector<16x128xf32>
    %2 = tpu.matmul %0, %1, %cst {dimension_numbers = #tpu.dot_dimension_numbers<[1], [0], [0], [1], [0, 0, 1, 1], [], []>} : vector<16x128xbf16>, vector<128x128xbf16>, vector<16x128xf32> -> vector<16x128xf32>
    %c0_3 = arith.constant 0 : index
    %c0_4 = arith.constant 0 : index
    %3 = vector.load %arg3[%c0_3, %c0_4] : memref<1x128xf32, #tpu.memory_space<vmem>>, vector<1x128xf32>
    %4 = vector.broadcast %3 : vector<1x128xf32> to vector<16x128xf32>
    %5 = arith.addf %2, %4 : vector<16x128xf32>
    %cst_5 = arith.constant 0.000000e+00 : f32
    %6 = vector.broadcast %cst_5 : f32 to vector<16x128xf32>
    %7 = arith.maximumf %5, %6 : vector<16x128xf32>
    %c0_6 = arith.constant 0 : index
    %c0_7 = arith.constant 0 : index
    %8 = vector.load %arg4[%c0_6, %c0_7] : memref<16x128xf32, #tpu.memory_space<vmem>>, vector<16x128xf32>
    tpu.vector_store %arg4[%c0_6, %c0_7], %7 {strides = array<i32>} : memref<16x128xf32, #tpu.memory_space<vmem>>, vector<16x128xf32>,
    return
  }
  func.func @transform_0(%arg0: i32) -> (i32, i32) {
    %c0_i32 = arith.constant 0 : i32
    %c0_i32_0 = arith.constant 0 : i32
    return %arg0, %c0_i32 : i32, i32
  }
  func.func @transform_1(%arg0: i32) -> (i32, i32) {
    %c0_i32 = arith.constant 0 : i32
    %c0_i32_0 = arith.constant 0 : i32
    %c0_i32_1 = arith.constant 0 : i32
    return %c0_i32, %c0_i32_0 : i32, i32
  }
  func.func @transform_2(%arg0: i32) -> (i32, i32) {
    %c0_i32 = arith.constant 0 : i32
    %c0_i32_0 = arith.constant 0 : i32
    %c0_i32_1 = arith.constant 0 : i32
    return %c0_i32, %c0_i32_0 : i32, i32
  }
  func.func @transform_3(%arg0: i32) -> (i32, i32) {
    %c0_i32 = arith.constant 0 : i32
    %c0_i32_0 = arith.constant 0 : i32
    return %arg0, %c0_i32 : i32, i32
  }
}

</mosaic_0001>

<bundles_post_ra>
// kernel: tpu_custom_call.1
= control target key start
LH: loop header
LB: loop body
LE: loop exit
PB: predicated region body
PF: predicated region fallthrough
CT: control target
= control target key end

     0   :  { %8 = vsyncpa [#allocation3], 0  ;;  %s350_s0 = inlined_call_operand.hbm [shape: bf16[16,128], index: 0, kind: input, shape index: {}]   ;;  %s351_s1 = inlined_call_operand.hbm [shape: bf16[128,128], index: 1, kind: input, shape index: {}]   ;;  %s352_s2 = inlined_call_operand.vmem [shape: f32[1,128], index: 2, kind: input, shape index: {}]   ;;  %s353_s3 = inlined_call_operand.hbm [shape: f32[16,128], index: 3, kind: output, shape index: {}]  }
   0x1   :  { %9 = vsyncpa [#allocation6], 0 }
   0x2   :  { %10 = vsyncpa [#allocation4], 0  ;;  %s309_s12 = smov [#allocation2]  }
   0x3   :  { %s16_s13 = sshll.u32 %s309_s12, 4  ;;  %s17_s13 = int_to_ptr.vmem [resolvable:$true] %s16_s13 }
   0x4   :  { %s251_s14 = scalar_lea.vmem %s17_s13, 128  ;;  %p256_p1 = scmp.lt.s32.totalorder %s17_s13, %s17_s13 }
   0x5   :  { %p252_p0 = scmp.ne.s32.totalorder %s17_s13, %s251_s14  ;;  %p257_p2 = scmp.lt.s32.totalorder %s251_s14, %s251_s14 }
   0x7   :  { %p258_p3 = por %p257_p2, %p256_p1 }
   0x9   :  { %p259_p4 = pnand %p258_p3, %p252_p0 }
   0xb   :  { %262 = shalt.err (!%p259_p4)
}
   0xc   :  { %s310_s15 = smov 64   ;;  %s311_s16 = smov 4  }
   0xd   :  { %22 = dma.hbm_to_vmem [thread:$0]  %s350_s0, 128, %s17_s13, [#allocation3], %s310_s15, %s310_s15, %s311_s16  }
   0xe   :  { %s312_s19 = smov [#allocation5]  }
   0xf   :  { %s28_s20 = sshll.u32 %s312_s19, 4  ;;  %s29_s20 = int_to_ptr.vmem [resolvable:$true] %s28_s20 }
  0x10   :  { %s271_s21 = scalar_lea.vmem %s29_s20, 1024  ;;  %p276_p6 = scmp.lt.s32.totalorder %s29_s20, %s29_s20 }
  0x11   :  { %p272_p5 = scmp.ne.s32.totalorder %s29_s20, %s271_s21  ;;  %p277_p7 = scmp.lt.s32.totalorder %s271_s21, %s271_s21 }
  0x13   :  { %p278_p8 = por %p277_p7, %p276_p6 }
  0x15   :  { %p279_p9 = pnand %p278_p8, %p272_p5 }
  0x17   :  { %282 = shalt.err (!%p279_p9)
}
  0x18   :  { %34 = dma.hbm_to_vmem [thread:$0]  %s351_s1, 1024, %s29_s20, [#allocation6], %s310_s15, %s310_s15, %s311_s16  }
  0x19   :  { %303 = dma.done.wait [#allocation3], 128  }
  0x1a   :  { %304 = vsyncadd [#allocation3], 4294967168 }
  0x1b   :  { %305 = dma.done.wait [#allocation6], 1024  }
  0x1c   :  { %306 = vsyncadd [#allocation6], 4294966272  ;;  %v313_v0 = vmov 0.0   ;;  %vm314_vm0 = vmmov 0   ;;  %v234_v1 = vld [vmem:[#allocation5 + $0x38] sm:$0xff]   ;;  %v235_v2 = vld [vmem:[#allocation5 + $0x30] sm:$0xff]  }
  0x1d   :  { %205 = vmatprep.subr.bf16.mxu0 %v313_v0  ;;  %221 = vmatprep.mubr.msk.bf16.mxu0 %vm314_vm0, %v313_v0  ;;  %v236_v3 = vld [vmem:[#allocation5 + $0x28] sm:$0xff]   ;;  %v237_v4 = vld [vmem:[#allocation5 + $0x20] sm:$0xff]   ;;  %v238_v5 = vld [vmem:[#allocation5 + $0x18] sm:$0xff]   ;;  %s315_s24 = smov [#allocation7]  }
  0x1e   :  { %206 = vmatpush3.bf16.msra.mxu0 %v234_v1  ;;  %v239_v6 = vld [vmem:[#allocation5 + $0x10] sm:$0xff]   ;;  %v240_v7 = vld [vmem:[#allocation5 + $0x8] sm:$0xff]   ;;  %v241_v8 = vld [vmem:[#allocation5] sm:$0xff]   ;;  %s173_s25 = sshll.u32 %s315_s24, 4  ;;  %s174_s25 = int_to_ptr.vmem [resolvable:$true] %s173_s25 }
  0x1f   :  { %207 = vmatprep.subr.bf16.mxu0 %v313_v0  ;;  %v242_v9 = vld [vmem:[#allocation2] sm:$0xff]   ;;  %s283_s26 = scalar_lea.vmem %s174_s25, 256  ;;  %p288_p11 = scmp.lt.s32.totalorder %s174_s25, %s174_s25 }
  0x20   :  { %v186_v10 = vld [vmem:[%s352_s2] ss:$0 sm:$0xff]  ;;  %p284_p10 = scmp.ne.s32.totalorder %s174_s25, %s283_s26  ;;  %p289_p12 = scmp.lt.s32.totalorder %s283_s26, %s283_s26 }
  0x22   :  { %208 = vmatpush3.bf16.msra.mxu0 %v235_v2  ;;  %p290_p13 = por %p289_p12, %p288_p11 }
  0x23   :  { %209 = vmatprep.subr.bf16.mxu0 %v313_v0 }
  0x24   :  { %p291_p0 = pnand %p290_p13, %p284_p10 }
  0x26   :  { %210 = vmatpush3.bf16.msra.mxu0 %v236_v3 }
  0x27   :  { %211 = vmatprep.subr.bf16.mxu0 %v313_v0 }
  0x2a   :  { %212 = vmatpush3.bf16.msra.mxu0 %v237_v4 }
  0x2b   :  { %213 = vmatprep.subr.bf16.mxu0 %v313_v0 }
  0x2e   :  { %214 = vmatpush3.bf16.msra.mxu0 %v238_v5 }
  0x2f   :  { %215 = vmatprep.subr.bf16.mxu0 %v313_v0 }
  0x32   :  { %216 = vmatpush3.bf16.msra.mxu0 %v239_v6 }
  0x33   :  { %217 = vmatprep.subr.bf16.mxu0 %v313_v0 }
  0x36   :  { %218 = vmatpush3.bf16.msra.mxu0 %v240_v7 }
  0x37   :  { %219 = vmatprep.subr.bf16.mxu0 %v313_v0 }
  0x3a   :  { %220 = vmatpush3.bf16.msra.mxu0 %v241_v8 }
  0x3d   :  { %222 = vmatmul.mubr.bf16.vlgmr.msra.gmra.mxu0 %v242_v9 }
  0xfd   :  { %v157_v11 = vpop.f32.mrf.mxu0 }
  0xfe   :  { %v158_v12 = vadd.f32 %v186_v10, %v157_v11 }
  0xff   :  { %v223_v13 = vpop.f32.mrf.mxu0 }
 0x100   :  { %v164_v14 = vmax.f32 %v158_v12, 0.0 }
 0x101   :  { %v160_v15 = vpop.f32.mrf.mxu0 }
 0x102   :  { %166 = vst [vmem:[#allocation7] sm:$0xff] %v164_v14  ;;  %v161_v16 = vadd.f32 %v186_v10, %v160_v15 }
 0x103   :  { %v224_v17 = vpop.f32.mrf.mxu0 }
 0x104   :  { %v165_v18 = vmax.f32 %v161_v16, 0.0 }
 0x106   :  { %167 = vst [vmem:[#allocation7 + $0x8] sm:$0xff] %v165_v18 }
 0x107   :  { %294 = shalt.err (!%p291_p0)
}
 0x108   :  { %s316_s2 = smov 128   ;;  %s317_s27 = smov 8  }
 0x109   :  { %179 = dma.vmem_to_hbm [thread:$0]  %s174_s25, 256, %s353_s3, [#allocation4], %s316_s2, %s316_s2, %s317_s27  }
 0x10a   :  { %307 = dma.done.wait [#allocation4], 256  }
 0x10b   :  { %308 = vsyncadd [#allocation4], 4294967040 }
 0x10c   :  { %183 = vsyncpa [#allocation3], 1 }
 0x10d   :  { %184 = vsyncpa [#allocation6], 1 }
 0x10e   :  { %185 = vsyncpa [#allocation4], 1 }

</bundles_post_ra>
